<compile_context>
chip_gen: v6e
topology: v6e:2x2x1
jax: 0.10.0
libtpu: 0.0.40
codegen_flags: <defaults>
</compile_context>

<pallas_src>
import jax
import jax.numpy as jnp
from jax.experimental import pallas as pl
from jax.experimental.pallas import tpu as pltpu


def mf_kernel(u_idx_ref, i_idx_ref, ut_ref, it_ref, o_ref):
    # u_idx_ref / i_idx_ref: (1, TB) int32, batch on lanes.
    # ut_ref: (F, num_users) f32, it_ref: (F, num_items) f32 (VMEM-resident).
    # o_ref: (1, TB) f32, lane-dense output row for this batch tile.
    nu = ut_ref.shape[1]
    ni = it_ref.shape[1]
    tb = o_ref.shape[1]

    u_ids = u_idx_ref[...]                                   # (1, TB)
    i_ids = i_idx_ref[...]                                   # (1, TB)

    # One-hot gather via MXU: (F, num_*) @ (num_*, TB) -> (F, TB), batch in lanes.
    u_onehot = (jax.lax.broadcasted_iota(jnp.int32, (nu, tb), 0)
                == u_ids).astype(jnp.float32)                # (num_users, TB)
    i_onehot = (jax.lax.broadcasted_iota(jnp.int32, (ni, tb), 0)
                == i_ids).astype(jnp.float32)                # (num_items, TB)

    u_emb = jnp.dot(ut_ref[...], u_onehot,
                    preferred_element_type=jnp.float32,
                    precision=jax.lax.Precision.HIGHEST)     # (F, TB)
    i_emb = jnp.dot(it_ref[...], i_onehot,
                    preferred_element_type=jnp.float32,
                    precision=jax.lax.Precision.HIGHEST)     # (F, TB)

    # Elementwise product, reduce over the sublane (factor) axis -> (1, TB).
    o_ref[...] = jnp.sum(u_emb * i_emb, axis=0, keepdims=True)


def matrix_factorization_forward(user_factors, item_factors, user, item,
                                 *, max_tile=512):
    """Equivalent of MatrixFactorization.forward(user, item) in eval mode."""
    B = int(user.shape[0])
    num_users, F = user_factors.shape
    num_items, _ = item_factors.shape

    # Batch tile on the lane axis: multiple of 128, capped at max_tile.
    tb = min(max_tile, pl.cdiv(B, 128) * 128)
    n_tiles = pl.cdiv(B, tb)
    bp = n_tiles * tb

    # Pad indices (padded lanes gather row 0, results are sliced off).
    user_ids = jnp.zeros((bp,), jnp.int32).at[:B].set(user.astype(jnp.int32))
    item_ids = jnp.zeros((bp,), jnp.int32).at[:B].set(item.astype(jnp.int32))
    user_tiles = user_ids.reshape(n_tiles, tb)
    item_tiles = item_ids.reshape(n_tiles, tb)

    # Factor dim on sublanes, table rows on lanes (batch-in-lanes compute).
    u_t = user_factors.astype(jnp.float32).T                 # (F, num_users)
    i_t = item_factors.astype(jnp.float32).T                 # (F, num_items)

    out = pl.pallas_call(
        mf_kernel,
        out_shape=jax.ShapeDtypeStruct((n_tiles, tb), jnp.float32),
        grid_spec=pltpu.PrefetchScalarGridSpec(
            num_scalar_prefetch=0,
            grid=(n_tiles,),
            in_specs=[
                pl.BlockSpec((1, tb), lambda t: (t, 0)),            # user id tile
                pl.BlockSpec((1, tb), lambda t: (t, 0)),            # item id tile
                pl.BlockSpec((F, num_users), lambda t: (0, 0)),     # resident user table
                pl.BlockSpec((F, num_items), lambda t: (0, 0)),     # resident item table
            ],
            out_specs=pl.BlockSpec((1, tb), lambda t: (t, 0)),
        ),
        compiler_params=pltpu.CompilerParams(
            dimension_semantics=("parallel",)),
    )(user_tiles, item_tiles, u_t, i_t)

    return out.reshape(-1)[:B]                               # (B,)


if __name__ == "__main__":
    # Module hyperparameters (small, consistent with the nn.Module __init__)
    num_users, num_items, num_factors = 64, 128, 32
    batch = 8

    key = jax.random.PRNGKey(0)
    k_uw, k_iw, k_u, k_i = jax.random.split(key, 4)

    # nn.init.normal_(weight, std=0.01), deterministic
    user_factors = 0.01 * jax.random.normal(
        k_uw, (num_users, num_factors), dtype=jnp.float32)
    item_factors = 0.01 * jax.random.normal(
        k_iw, (num_items, num_factors), dtype=jnp.float32)

    user = jax.random.randint(k_u, (batch,), 0, num_users, dtype=jnp.int32)
    item = jax.random.randint(k_i, (batch,), 0, num_items, dtype=jnp.int32)

    out = matrix_factorization_forward(user_factors, item_factors, user, item)
    out = jax.block_until_ready(out)

    # Pure-JAX reference check (eval-mode dropout == identity)
    ref = jnp.sum(user_factors[user] * item_factors[item], axis=1)
    assert out.shape == (batch,)
    assert jnp.allclose(out, ref, atol=1e-5, rtol=1e-4)

    print("KERNEL_OK")
</pallas_src>

<mosaic_0001>
module attributes {stable_mosaic.version = 11 : i64} {
  func.func @mf_kernel(%arg0: i32, %arg1: memref<1x128xi32, #tpu.memory_space<vmem>>, %arg2: memref<1x128xi32, #tpu.memory_space<vmem>>, %arg3: memref<32x64xf32, #tpu.memory_space<vmem>>, %arg4: memref<32x128xf32, #tpu.memory_space<vmem>>, %arg5: memref<1x128xf32, #tpu.memory_space<vmem>>) attributes {dimension_semantics = [#tpu.dimension_semantics<parallel>], iteration_bounds = array<i64: 1>, scalar_prefetch = 0 : i64, scratch_operands = 0 : i64, tpu.core_type = #tpu.core_type<tc>, window_params = [{transform_indices = @transform_0, window_bounds = array<i64: 1, 128>}, {transform_indices = @transform_1, window_bounds = array<i64: 1, 128>}, {pipeline_mode = #tpu.pipeline_mode<synchronous>, transform_indices = @transform_2, window_bounds = array<i64: 32, 64>}, {pipeline_mode = #tpu.pipeline_mode<synchronous>, transform_indices = @transform_3, window_bounds = array<i64: 32, 128>}, {transform_indices = @transform_4, window_bounds = array<i64: 1, 128>}]} {
    %c0 = arith.constant 0 : index
    %c0_0 = arith.constant 0 : index
    %0 = vector.load %arg1[%c0, %c0_0] : memref<1x128xi32, #tpu.memory_space<vmem>>, vector<1x128xi32>
    %c0_1 = arith.constant 0 : index
    %c0_2 = arith.constant 0 : index
    %1 = vector.load %arg2[%c0_1, %c0_2] : memref<1x128xi32, #tpu.memory_space<vmem>>, vector<1x128xi32>
    %2 = tpu.iota {dimensions = array<i32: 0>} : vector<64x128xi32>
    %3 = vector.broadcast %0 : vector<1x128xi32> to vector<64x128xi32>
    %4 = arith.cmpi eq, %2, %3 : vector<64x128xi32>
    %5 = arith.extui %4 : vector<64x128xi1> to vector<64x128xi32>
    %6 = arith.sitofp %5 : vector<64x128xi32> to vector<64x128xf32>
    %7 = tpu.iota {dimensions = array<i32: 0>} : vector<128x128xi32>
    %8 = vector.broadcast %1 : vector<1x128xi32> to vector<128x128xi32>
    %9 = arith.cmpi eq, %7, %8 : vector<128x128xi32>
    %10 = arith.extui %9 : vector<128x128xi1> to vector<128x128xi32>
    %11 = arith.sitofp %10 : vector<128x128xi32> to vector<128x128xf32>
    %c0_3 = arith.constant 0 : index
    %c0_4 = arith.constant 0 : index
    %12 = vector.load %arg3[%c0_3, %c0_4] : memref<32x64xf32, #tpu.memory_space<vmem>>, vector<32x64xf32>
    %cst = arith.constant dense<0.000000e+00> : vector<32x128xf32>
    %13 = tpu.matmul %12, %6, %cst {dimension_numbers = #tpu.dot_dimension_numbers<[1], [0], [0], [1], [0, 0, 1, 1], [], []>, precision = #tpu.contract_precision<fp32>} : vector<32x64xf32>, vector<64x128xf32>, vector<32x128xf32> -> vector<32x128xf32>
    %c0_5 = arith.constant 0 : index
    %c0_6 = arith.constant 0 : index
    %14 = vector.load %arg4[%c0_5, %c0_6] : memref<32x128xf32, #tpu.memory_space<vmem>>, vector<32x128xf32>
    %cst_7 = arith.constant dense<0.000000e+00> : vector<32x128xf32>
    %15 = tpu.matmul %14, %11, %cst_7 {dimension_numbers = #tpu.dot_dimension_numbers<[1], [0], [0], [1], [0, 0, 1, 1], [], []>, precision = #tpu.contract_precision<fp32>} : vector<32x128xf32>, vector<128x128xf32>, vector<32x128xf32> -> vector<32x128xf32>
    %16 = arith.mulf %13, %15 : vector<32x128xf32>
    %cst_8 = arith.constant dense<0.000000e+00> : vector<128xf32>
    %17 = vector.multi_reduction <add>, %16, %cst_8 [0] : vector<32x128xf32> to vector<128xf32>
    %18 = vector.shape_cast %17 : vector<128xf32> to vector<1x128xf32>
    %c0_9 = arith.constant 0 : index
    %c0_10 = arith.constant 0 : index
    %19 = vector.load %arg5[%c0_9, %c0_10] : memref<1x128xf32, #tpu.memory_space<vmem>>, vector<1x128xf32>
    tpu.vector_store %arg5[%c0_9, %c0_10], %18 {strides = array<i32>} : memref<1x128xf32, #tpu.memory_space<vmem>>, vector<1x128xf32>,
    return
  }
  func.func @transform_0(%arg0: i32) -> (i32, i32) {
    %c0_i32 = arith.constant 0 : i32
    %c0_i32_0 = arith.constant 0 : i32
    return %arg0, %c0_i32 : i32, i32
  }
  func.func @transform_1(%arg0: i32) -> (i32, i32) {
    %c0_i32 = arith.constant 0 : i32
    %c0_i32_0 = arith.constant 0 : i32
    return %arg0, %c0_i32 : i32, i32
  }
  func.func @transform_2(%arg0: i32) -> (i32, i32) {
    %c0_i32 = arith.constant 0 : i32
    %c0_i32_0 = arith.constant 0 : i32
    %c0_i32_1 = arith.constant 0 : i32
    return %c0_i32, %c0_i32_0 : i32, i32
  }
  func.func @transform_3(%arg0: i32) -> (i32, i32) {
    %c0_i32 = arith.constant 0 : i32
    %c0_i32_0 = arith.constant 0 : i32
    %c0_i32_1 = arith.constant 0 : i32
    return %c0_i32, %c0_i32_0 : i32, i32
  }
  func.func @transform_4(%arg0: i32) -> (i32, i32) {
    %c0_i32 = arith.constant 0 : i32
    %c0_i32_0 = arith.constant 0 : i32
    return %arg0, %c0_i32 : i32, i32
  }
}

</mosaic_0001>

<bundles_post_ra>
// kernel: tpu_custom_call.1
= control target key start
LH: loop header
LB: loop body
LE: loop exit
PB: predicated region body
PF: predicated region fallthrough
CT: control target
= control target key end

     0   :  { %9 = vsyncpa [#allocation3], 0  ;;  %s3494_s0 = inlined_call_operand.hbm [shape: s32[1,128], index: 0, kind: input, shape index: {}]   ;;  %s3495_s1 = inlined_call_operand.vmem [shape: s32[1,128], index: 1, kind: input, shape index: {}]   ;;  %s3496_s2 = inlined_call_operand.hbm [shape: f32[32,64], index: 2, kind: input, shape index: {}]   ;;  %s3497_s3 = inlined_call_operand.hbm [shape: f32[32,128], index: 3, kind: input, shape index: {}]   ;;  %s3498_s4 = inlined_call_operand.hbm [shape: f32[1,128], index: 4, kind: output, shape index: {}]  }
   0x1   :  { %10 = vsyncpa [#allocation6], 0 }
   0x2   :  { %11 = vsyncpa [#allocation4], 0  ;;  %s2387_s15 = smov [#allocation5]  }
   0x3   :  { %s29_s16 = sshll.u32 %s2387_s15, 4  ;;  %s30_s16 = int_to_ptr.vmem [resolvable:$true] %s29_s16 }
   0x4   :  { %s2309_s17 = scalar_lea.vmem %s30_s16, 512  ;;  %p2314_p1 = scmp.lt.s32.totalorder %s30_s16, %s30_s16 }
   0x5   :  { %p2310_p0 = scmp.ne.s32.totalorder %s30_s16, %s2309_s17  ;;  %p2315_p2 = scmp.lt.s32.totalorder %s2309_s17, %s2309_s17 }
   0x7   :  { %p2316_p3 = por %p2315_p2, %p2314_p1 }
   0x9   :  { %p2317_p4 = pnand %p2316_p3, %p2310_p0 }
   0xb   :  { %2320 = shalt.err (!%p2317_p4)
}
   0xc   :  { %s2388_s18 = smov 128   ;;  %s2389_s19 = smov 8  }
   0xd   :  { %35 = dma.hbm_to_vmem [thread:$0]  %s3496_s2, 512, %s30_s16, [#allocation6], %s2388_s18, %s2388_s18, %s2389_s19  }
   0xe   :  { %s2390_s22 = smov [#allocation2]   ;;  %s2391_s24 = smov [#allocation7]  }
   0xf   :  { %s18_s23 = sshll.u32 %s2390_s22, 4  ;;  %s41_s25 = sshll.u32 %s2391_s24, 4  ;;  %s19_s23 = int_to_ptr.vmem [resolvable:$true] %s18_s23  ;;  %s42_s25 = int_to_ptr.vmem [resolvable:$true] %s41_s25 }
  0x10   :  { %s2329_s26 = scalar_lea.vmem %s19_s23, 16  ;;  %s2333_s27 = scalar_lea.vmem %s19_s23, 32 }
  0x11   :  { %p2330_p5 = scmp.ne.s32.totalorder %s19_s23, %s2329_s26  ;;  %p2334_p6 = scmp.lt.s32.totalorder %s19_s23, %s19_s23 }
  0x12   :  { %p2335_p7 = scmp.lt.s32.totalorder %s2333_s27, %s2329_s26 }
  0x14   :  { %p2336_p8 = por %p2335_p7, %p2334_p6 }
  0x16   :  { %p2337_p9 = pnand %p2336_p8, %p2330_p5 }
  0x18   :  { %2340 = shalt.err (!%p2337_p9)
}
  0x19   :  { %21 = dma.hbm_to_vmem [thread:$0]  %s3494_s0, 16, %s19_s23, [#allocation3]  }
  0x1a   :  { %s2349_s30 = scalar_lea.vmem %s42_s25, 512  ;;  %p2354_p11 = scmp.lt.s32.totalorder %s42_s25, %s42_s25 }
  0x1b   :  { %p2350_p10 = scmp.ne.s32.totalorder %s42_s25, %s2349_s30  ;;  %p2355_p12 = scmp.lt.s32.totalorder %s2349_s30, %s2349_s30 }
  0x1d   :  { %p2356_p13 = por %p2355_p12, %p2354_p11 }
  0x1f   :  { %p2357_p0 = pnand %p2356_p13, %p2350_p10 }
  0x21   :  { %2360 = shalt.err (!%p2357_p0)
}
  0x22   :  { %47 = dma.hbm_to_vmem [thread:$0]  %s3497_s3, 512, %s42_s25, [#allocation6], %s2388_s18, %s2388_s18, %s2389_s19  }
  0x23   :  { %2381 = dma.done.wait [#allocation3], 16  }
  0x24   :  { %2382 = vsyncadd [#allocation3], 4294967280 }
  0x25   :  { %2383 = dma.done.wait [#allocation6], 1024  }
  0x26   :  { %2384 = vsyncadd [#allocation6], 4294966272  ;;  %v59_v0 = vlaneseq  ;;  %v1643_v9 = vld [vmem:[#allocation2] ss:$0 sm:$0xff]  ;;  %vm160_vm0 = vcmask 523264   ;;  %v156_v14 = vld [vmem:[#allocation5] sm:$0xff] }
  0x27   :  { %v2392_v15 = vmov 1.0   ;;  %v2393_v17 = vmov 0.0   ;;  %v157_v25 = vld [vmem:[#allocation5 + $0x8] sm:$0xff]  ;;  %v162_v29 = vsel %vm160_vm0, %v156_v14, 0  ;;  %v158_v53 = vld [vmem:[#allocation5 + $0x10] sm:$0xff]  ;;  %v159_v54 = vld [vmem:[#allocation5 + $0x18] sm:$0xff] }
  0x28   :  { %v2429_v1 = vshrl.u32 %v59_v0, 7  ;;  %v2531_v33 = vand.u32 4294901760, %v162_v29  ;;  %v165_v35 = vsel %vm160_vm0, %v157_v25, 0  ;;  %v168_v0 = vsel %vm160_vm0, %v158_v53, 0 }
  0x29   :  { %v2565_v43 = vand.u32 4294901760, %v165_v35 }
  0x2a   :  { %v2432_v2 = vadd.s32 56, %v2429_v1  ;;  %v2435_v3 = vadd.s32 48, %v2429_v1  ;;  %v2438_v4 = vadd.s32 40, %v2429_v1  ;;  %v2441_v5 = vadd.s32 32, %v2429_v1  ;;  %1971 = vmatprep.mubr.f32.mxu1 %v2531_v33 }
  0x2b   :  { %v2444_v6 = vadd.s32 24, %v2429_v1  ;;  %v2447_v7 = vadd.s32 16, %v2429_v1  ;;  %v2450_v8 = vadd.s32 8, %v2429_v1  ;;  %vm2512_vm8 = vcmp.eq.s32.totalorder %v2429_v1, %v1643_v9 }
  0x2c   :  { %vm2453_vm1 = vcmp.eq.s32.totalorder %v2432_v2, %v1643_v9  ;;  %vm2458_vm2 = vcmp.eq.s32.totalorder %v2435_v3, %v1643_v9  ;;  %vm2463_vm3 = vcmp.eq.s32.totalorder %v2438_v4, %v1643_v9  ;;  %vm2468_vm4 = vcmp.eq.s32.totalorder %v2441_v5, %v1643_v9 }
  0x2d   :  { %1933 = vmatprep.subr.msk.mxu0 %vm2453_vm1, %v2392_v15  ;;  %vm2476_vm5 = vcmp.eq.s32.totalorder %v2444_v6, %v1643_v9  ;;  %v1651_v18 = vsel %vm2453_vm1, 1.0, %v2393_v17  ;;  %vm2484_vm6 = vcmp.eq.s32.totalorder %v2447_v7, %v1643_v9  ;;  %v1650_v20 = vsel %vm2458_vm2, 1.0, %v2393_v17 }
  0x2e   :  { %1934 = vmatpush3.msk.msra.mxu0 %vm2453_vm1, %v2392_v15  ;;  %v2494_v21 = vsub.f32 %v1651_v18, %v1651_v18  ;;  %v2496_v22 = vsub.f32 %v1650_v20, %v1650_v20  ;;  %vm2499_vm7 = vcmp.eq.s32.totalorder %v2450_v8, %v1643_v9  ;;  %v1649_v24 = vsel %vm2463_vm3, 1.0, %v2393_v17 }
  0x2f   :  { %1935 = vmatprep.subr.msk.mxu0 %vm2458_vm2, %v2392_v15  ;;  %v2509_v26 = vsub.f32 %v1649_v24, %v1649_v24  ;;  %v1648_v28 = vsel %vm2468_vm4, 1.0, %v2393_v17  ;;  %v1647_v36 = vsel %vm2476_vm5, 1.0, %v2393_v17  ;;  %v1646_v37 = vsel %vm2484_vm6, 1.0, %v2393_v17 }
  0x30   :  { %1936 = vmatpush3.msk.msra.mxu0 %vm2458_vm2, %v2392_v15  ;;  %v2524_v30 = vand.u32 4294901760, %v2494_v21  ;;  %v2527_v31 = vand.u32 4294901760, %v2496_v22  ;;  %v2529_v32 = vsub.f32 %v1648_v28, %v1648_v28  ;;  %v2557_v41 = vsub.f32 %v162_v29, %v2531_v33 }
  0x31   :  { %1937 = vmatprep.subr.msk.mxu0 %vm2463_vm3, %v2392_v15  ;;  %v2537_v34 = vand.u32 4294901760, %v2509_v26  ;;  %v2567_v44 = vsub.f32 %v1647_v36, %v1647_v36  ;;  %v2569_v45 = vsub.f32 %v1646_v37, %v1646_v37  ;;  %v2581_v50 = vsub.f32 %v165_v35, %v2565_v43 }
  0x32   :  { %1938 = vmatpush3.msk.msra.mxu0 %vm2463_vm3, %v2392_v15  ;;  %v306_v38 = vsub.f32 %v2494_v21, %v2524_v30  ;;  %v313_v39 = vsub.f32 %v2496_v22, %v2527_v31  ;;  %v2554_v40 = vand.u32 4294901760, %v2529_v32  ;;  %v248_v49 = vand.u32 4294901760, %v2557_v41 }
  0x33   :  { %1939 = vmatprep.subr.msk.mxu0 %vm2468_vm4, %v2392_v15  ;;  %v320_v42 = vsub.f32 %v2509_v26, %v2537_v34  ;;  %v2584_v51 = vand.u32 4294901760, %v2567_v44  ;;  %v2587_v52 = vand.u32 4294901760, %v2569_v45  ;;  %v1645_v57 = vsel %vm2499_vm7, 1.0, %v2393_v17 }
  0x34   :  { %1940 = vmatpush3.msk.msra.mxu0 %vm2468_vm4, %v2392_v15  ;;  %v307_v46 = vand.u32 4294901760, %v306_v38  ;;  %v314_v47 = vand.u32 4294901760, %v313_v39  ;;  %v327_v48 = vsub.f32 %v2529_v32, %v2554_v40  ;;  %v249_v56 = vsub.f32 %v2557_v41, %v248_v49 }
  0x35   :  { %1941 = vmatprep.subr.msk.mxu0 %vm2476_vm5, %v2392_v15  ;;  %v321_v55 = vand.u32 4294901760, %v320_v42  ;;  %v1644_v58 = vsel %vm2512_vm8, 1.0, %v2393_v17  ;;  %v258_v59 = vand.u32 4294901760, %v2581_v50  ;;  %v334_v60 = vsub.f32 %v2567_v44, %v2584_v51 }
  0x36   :  { %1942 = vmatpush3.msk.msra.mxu0 %vm2476_vm5, %v2392_v15  ;;  %1955 = vmatprep.subr.mxu1 %v307_v46  ;;  %v2607_v61 = vsub.f32 %v1645_v57, %v1645_v57  ;;  %v328_v62 = vand.u32 4294901760, %v327_v48  ;;  %v2612_v63 = vsub.f32 %v1644_v58, %v1644_v58  ;;  %v171_v9 = vsel %vm160_vm0, %v159_v54, 0 }
  0x37   :  { %1943 = vmatprep.subr.msk.mxu0 %vm2484_vm6, %v2392_v15  ;;  %1956 = vmatpush3.msra.mxu1 %v307_v46  ;;  %v250_v14 = vand.u32 4294901760, %v249_v56  ;;  %v259_v18 = vsub.f32 %v2581_v50, %v258_v59  ;;  %v341_v20 = vsub.f32 %v2569_v45, %v2587_v52  ;;  %v2633_v28 = vand.u32 4294901760, %v168_v0 }
  0x38   :  { %1944 = vmatpush3.msk.msra.mxu0 %vm2484_vm6, %v2392_v15  ;;  %1957 = vmatprep.subr.mxu1 %v314_v47  ;;  %v2625_v24 = vand.u32 4294901760, %v2607_v61  ;;  %v2631_v25 = vand.u32 4294901760, %v2612_v63  ;;  %v2635_v29 = vand.u32 4294901760, %v171_v9  ;;  %v335_v36 = vand.u32 4294901760, %v334_v60 }
  0x39   :  { %1945 = vmatprep.subr.msk.mxu0 %vm2499_vm7, %v2392_v15  ;;  %1958 = vmatpush3.msra.mxu1 %v314_v47  ;;  %v260_v35 = vand.u32 4294901760, %v259_v18  ;;  %v2646_v38 = vsub.f32 %v168_v0, %v2633_v28  ;;  %v342_v42 = vand.u32 4294901760, %v341_v20  ;;  %v97_v12 = vadd.s32 72, %v2429_v1 }
  0x3a   :  { %1946 = vmatpush3.msk.msra.mxu0 %vm2499_vm7, %v2392_v15  ;;  %1959 = vmatprep.subr.mxu1 %v321_v55  ;;  %v348_v37 = vsub.f32 %v2607_v61, %v2625_v24  ;;  %v2649_v39 = vsub.f32 %v171_v9, %v2635_v29  ;;  %v355_v46 = vsub.f32 %v2612_v63, %v2631_v25 }
  0x3b   :  { %1947 = vmatprep.subr.msk.mxu0 %vm2512_vm8, %v2392_v15  ;;  %1960 = vmatpush3.msra.mxu1 %v321_v55  ;;  %v268_v47 = vand.u32 4294901760, %v2646_v38 }
  0x3c   :  { %1948 = vmatpush3.msk.msra.mxu0 %vm2512_vm8, %v2392_v15  ;;  %1961 = vmatprep.subr.mxu1 %v328_v62  ;;  %v349_v48 = vand.u32 4294901760, %v348_v37  ;;  %v278_v53 = vand.u32 4294901760, %v2649_v39  ;;  %v356_v54 = vand.u32 4294901760, %v355_v46 }
  0x3d   :  { %1949 = vmatprep.mubr.f32.mxu0 %v250_v14  ;;  %1962 = vmatpush3.msra.mxu1 %v328_v62  ;;  %v269_v55 = vsub.f32 %v2646_v38, %v268_v47  ;;  %v96_v62 = vadd.s32 64, %v2429_v1 }
  0x3e   :  { %1977 = vmatprep.subr.mxu0 %v2494_v21  ;;  %1950 = vmatmul.mubr.f32.vlgmr.msra.gmra.mxu0 %v260_v35 }
  0x3f   :  { %1963 = vmatprep.subr.mxu1 %v335_v36  ;;  %1978 = vmatpush3.msra.mxu0 %v2494_v21  ;;  %v279_v21 = vsub.f32 %v2649_v39, %v278_v53 }
  0x40   :  { %1964 = vmatpush3.msra.mxu1 %v335_v36  ;;  %1979 = vmatprep.subr.mxu0 %v2496_v22 }
  0x41   :  { %1965 = vmatprep.subr.mxu1 %v342_v42  ;;  %1980 = vmatpush3.msra.mxu0 %v2496_v22  ;;  %v270_v22 = vand.u32 4294901760, %v269_v55  ;;  %v280_v56 = vand.u32 4294901760, %v279_v21  ;;  %v839_v21 = vld [vmem:[#allocation7] sm:$0xff] }
  0x42   :  { %1966 = vmatpush3.msra.mxu1 %v342_v42  ;;  %1981 = vmatprep.subr.mxu0 %v2509_v26 }
  0x43   :  { %1967 = vmatprep.subr.mxu1 %v349_v48  ;;  %1982 = vmatpush3.msra.mxu0 %v2509_v26  ;;  %v103_v26 = vadd.s32 120, %v2429_v1 }
  0x44   :  { %1968 = vmatpush3.msra.mxu1 %v349_v48  ;;  %1983 = vmatprep.subr.mxu0 %v2529_v32 }
  0x45   :  { %1969 = vmatprep.subr.mxu1 %v356_v54  ;;  %1984 = vmatpush3.msra.mxu0 %v2529_v32 }
  0x46   :  { %1970 = vmatpush3.msra.mxu1 %v356_v54  ;;  %1985 = vmatprep.subr.mxu0 %v2567_v44 }
  0x47   :  { %1972 = vmatmul.mubr.f32.vlgmr.msra.gmra.mxu1 %v2565_v43  ;;  %1986 = vmatpush3.msra.mxu0 %v2567_v44 }
  0x48   :  { %1999 = vmatprep.subr.msk.mxu1 %vm2453_vm1, %v2392_v15  ;;  %1987 = vmatprep.subr.mxu0 %v2569_v45 }
  0x49   :  { %2000 = vmatpush3.msk.msra.mxu1 %vm2453_vm1, %v2392_v15  ;;  %1952 = vmatprep.mubr.f32.mxu0 %v270_v22 }
  0x4a   :  { %1988 = vmatpush3.msra.mxu0 %v2569_v45  ;;  %2001 = vmatprep.subr.msk.mxu1 %vm2458_vm2, %v2392_v15  ;;  %v99_v45 = vadd.s32 88, %v2429_v1 }
  0x4b   :  { %1953 = vmatmul.mubr.f32.gmra.mxu0 %v280_v56  ;;  %1989 = vmatprep.subr.mxu0 %v2607_v61 }
  0x4c   :  { %2002 = vmatpush3.msk.msra.mxu1 %vm2458_vm2, %v2392_v15  ;;  %1990 = vmatpush3.msra.mxu0 %v2607_v61 }
  0x4d   :  { %2003 = vmatprep.subr.msk.mxu1 %vm2463_vm3, %v2392_v15  ;;  %1991 = vmatprep.subr.mxu0 %v2612_v63 }
  0x4e   :  { %2004 = vmatpush3.msk.msra.mxu1 %vm2463_vm3, %v2392_v15  ;;  %1992 = vmatpush3.msra.mxu0 %v2612_v63 }
  0x4f   :  { %1993 = vmatprep.mubr.f32.mxu0 %v2557_v41  ;;  %2005 = vmatprep.subr.msk.mxu1 %vm2468_vm4, %v2392_v15  ;;  %v100_v41 = vadd.s32 96, %v2429_v1 }
  0x50   :  { %1994 = vmatmul.mubr.f32.vlgmr.msra.gmra.mxu0 %v2581_v50  ;;  %2006 = vmatpush3.msk.msra.mxu1 %vm2468_vm4, %v2392_v15 }
  0x51   :  { %2021 = vmatprep.subr.mxu0 %v2524_v30  ;;  %1974 = vmatprep.mubr.f32.mxu1 %v2633_v28 }
  0x52   :  { %2007 = vmatprep.subr.msk.mxu1 %vm2476_vm5, %v2392_v15  ;;  %2022 = vmatpush3.msra.mxu0 %v2524_v30  ;;  %v2736_v30 = vld [vmem:[%s3495_s1] ss:$0 sm:$0xff]  ;;  %s2394_s1 = smov [#allocation8]  }
  0x53   :  { %1975 = vmatmul.mubr.f32.gmra.mxu1 %v2635_v29  ;;  %2023 = vmatprep.subr.mxu0 %v2527_v31  ;;  %vm2751_vm9 = vcmp.eq.s32.totalorder %v103_v26, %v2736_v30  ;;  %vm2804_vm12 = vcmp.eq.s32.totalorder %v100_v41, %v2736_v30  ;;  %vm2814_vm13 = vcmp.eq.s32.totalorder %v99_v45, %v2736_v30  ;;  %v3022_v45 = vand.u32 4294901760, %v839_v21  ;;  %s1633_s6 = sshll.u32 %s2394_s1, 4  ;;  %s1634_s6 = int_to_ptr.vmem [resolvable:$true] %s1633_s6 }
  0x54   :  { %2008 = vmatpush3.msk.msra.mxu1 %vm2476_vm5, %v2392_v15  ;;  %1996 = vmatprep.mubr.f32.mxu0 %v2646_v38  ;;  %v1668_v44 = vsel %vm2751_vm9, 1.0, %v2393_v17  ;;  %v1665_v60 = vsel %vm2804_vm12, 1.0, %v2393_v17  ;;  %v1664_v63 = vsel %vm2814_vm13, 1.0, %v2393_v17  ;;  %vm2869_vm15 = vcmp.eq.s32.totalorder %v97_v12, %v2736_v30  ;;  %s2361_s7 = scalar_lea.vmem %s1634_s6, 16  ;;  %s2365_s8 = scalar_lea.vmem %s1634_s6, 32 }
  0x55   :  { %2009 = vmatprep.subr.msk.mxu1 %vm2484_vm6, %v2392_v15  ;;  %2024 = vmatpush3.msra.mxu0 %v2527_v31  ;;  %v102_v31 = vadd.s32 112, %v2429_v1  ;;  %v2797_v50 = vsub.f32 %v1668_v44, %v1668_v44  ;;  %v2873_v14 = vsub.f32 %v1665_v60, %v1665_v60  ;;  %v2883_v18 = vsub.f32 %v1664_v63, %v1664_v63  ;;  %v840_v44 = vld [vmem:[#allocation7 + $0x8] sm:$0xff]  ;;  %p2362_p1 = scmp.ne.s32.totalorder %s1634_s6, %s2361_s7  ;;  %p2366_p2 = scmp.lt.s32.totalorder %s1634_s6, %s1634_s6 }
  0x56   :  { %1997 = vmatmul.mubr.f32.gmra.mxu0 %v2649_v39  ;;  %2010 = vmatpush3.msk.msra.mxu1 %vm2484_vm6, %v2392_v15  ;;  %vm2896_vm0 = vcmp.eq.s32.totalorder %v96_v62, %v2736_v30  ;;  %v1662_v36 = vsel %vm2869_vm15, 1.0, %v2393_v17  ;;  %v3047_v62 = vand.u32 4294901760, %v840_v44  ;;  %p2367_p3 = scmp.lt.s32.totalorder %s2365_s8, %s2361_s7 }
  0x57   :  { %2025 = vmatprep.subr.mxu0 %v2537_v34  ;;  %2011 = vmatprep.subr.msk.mxu1 %vm2499_vm7, %v2392_v15  ;;  %vm2764_vm10 = vcmp.eq.s32.totalorder %v102_v31, %v2736_v30  ;;  %v2924_v37 = vand.u32 4294901760, %v2873_v14  ;;  %v2935_v39 = vand.u32 4294901760, %v2883_v18  ;;  %v1661_v42 = vsel %vm2896_vm0, 1.0, %v2393_v17 }
  0x58   :  { %2026 = vmatpush3.msra.mxu0 %v2537_v34  ;;  %2012 = vmatpush3.msk.msra.mxu1 %vm2499_vm7, %v2392_v15  ;;  %v101_v34 = vadd.s32 104, %v2429_v1  ;;  %v2978_v54 = vsub.f32 %v1661_v42, %v1661_v42  ;;  %p2368_p4 = por %p2367_p3, %p2366_p2 }
  0x59   :  { %2027 = vmatprep.subr.mxu0 %v2554_v40  ;;  %2013 = vmatprep.subr.msk.mxu1 %vm2512_vm8, %v2392_v15 }
  0x5a   :  { %2028 = vmatpush3.msra.mxu0 %v2554_v40  ;;  %2014 = vmatpush3.msk.msra.mxu1 %vm2512_vm8, %v2392_v15  ;;  %vm2787_vm11 = vcmp.eq.s32.totalorder %v101_v34, %v2736_v30  ;;  %p2369_p5 = pnand %p2368_p4, %p2362_p1 }
  0x5b   :  { %2015 = vmatprep.mubr.f32.mxu1 %v248_v49  ;;  %2029 = vmatprep.subr.mxu0 %v2584_v51  ;;  %v1667_v49 = vsel %vm2764_vm10, 1.0, %v2393_v17  ;;  %v1666_v58 = vsel %vm2787_vm11, 1.0, %v2393_v17 }
  0x5c   :  { %2016 = vmatmul.mubr.f32.vlgmr.msra.gmra.mxu1 %v258_v59  ;;  %2030 = vmatpush3.msra.mxu0 %v2584_v51  ;;  %v98_v51 = vadd.s32 80, %v2429_v1  ;;  %v2818_v57 = vsub.f32 %v1667_v49, %v1667_v49  ;;  %v2833_v59 = vand.u32 4294901760, %v2797_v50  ;;  %v2849_v13 = vsub.f32 %v1666_v58, %v1666_v58 }
  0x5d   :  { %2043 = vmatprep.subr.msk.mxu1 %vm2453_vm1, %v2392_v15  ;;  %2031 = vmatprep.subr.mxu0 %v2587_v52 }
  0x5e   :  { %2044 = vmatpush3.msk.msra.mxu1 %vm2453_vm1, %v2392_v15  ;;  %2032 = vmatpush3.msra.mxu0 %v2587_v52  ;;  %vm2845_vm14 = vcmp.eq.s32.totalorder %v98_v51, %v2736_v30  ;;  %v2862_v0 = vand.u32 4294901760, %v2818_v57  ;;  %v968_v16 = vsub.f32 %v2797_v50, %v2833_v59  ;;  %vm2910_vm1 = vcmp.eq.s32.totalorder %v2432_v2, %v2736_v30 }
  0x5f   :  { %2045 = vmatprep.subr.msk.mxu1 %vm2458_vm2, %v2392_v15  ;;  %2018 = vmatprep.mubr.f32.mxu1 %v268_v47  ;;  %v1663_v20 = vsel %vm2845_vm14, 1.0, %v2393_v17  ;;  %v2954_v47 = vsub.f32 %v1662_v36, %v1662_v36 }
  0x60   :  { %2033 = vmatprep.subr.mxu0 %v2625_v24  ;;  %2046 = vmatpush3.msk.msra.mxu1 %vm2458_vm2, %v2392_v15  ;;  %v975_v19 = vsub.f32 %v2818_v57, %v2862_v0  ;;  %v2926_v38 = vsub.f32 %v1663_v20, %v1663_v20  ;;  %v969_v2 = vand.u32 4294901760, %v968_v16  ;;  %vm2939_vm2 = vcmp.eq.s32.totalorder %v2435_v3, %v2736_v30 }
  0x61   :  { %2019 = vmatmul.mubr.f32.gmra.mxu1 %v278_v53  ;;  %2034 = vmatpush3.msra.mxu0 %v2625_v24  ;;  %v2893_v24 = vand.u32 4294901760, %v2849_v13  ;;  %v1660_v3 = vsel %vm2910_vm1, 1.0, %v2393_v17  ;;  %v2994_v56 = vand.u32 4294901760, %v2954_v47 }
  0x62   :  { %2047 = vmatprep.subr.msk.mxu1 %vm2463_vm3, %v2392_v15  ;;  %2035 = vmatprep.subr.mxu0 %v2631_v25  ;;  %v976_v48 = vand.u32 4294901760, %v975_v19  ;;  %v2976_v53 = vand.u32 4294901760, %v2926_v38  ;;  %v2988_v55 = vsub.f32 %v1660_v3, %v1660_v3 }
  0x63   :  { %2048 = vmatpush3.msk.msra.mxu1 %vm2463_vm3, %v2392_v15  ;;  %2036 = vmatpush3.msra.mxu0 %v2631_v25  ;;  %v982_v46 = vsub.f32 %v2849_v13, %v2893_v24  ;;  %vm2965_vm3 = vcmp.eq.s32.totalorder %v2438_v4, %v2736_v30  ;;  %v1659_v4 = vsel %vm2939_vm2, 1.0, %v2393_v17 }
  0x64   :  { %2037 = vmatprep.mubr.f32.mxu0 %v2531_v33  ;;  %2049 = vmatprep.subr.msk.mxu1 %vm2468_vm4, %v2392_v15  ;;  %v3009_v34 = vsub.f32 %v1659_v4, %v1659_v4  ;;  %v1658_v41 = vsel %vm2965_vm3, 1.0, %v2393_v17  ;;  %v3029_v51 = vand.u32 4294901760, %v2988_v55 }
  0x65   :  { %2038 = vmatmul.mubr.f32.vlgmr.msra.gmra.mxu0 %v2565_v43  ;;  %2050 = vmatpush3.msk.msra.mxu1 %vm2468_vm4, %v2392_v15  ;;  %v983_v22 = vand.u32 4294901760, %v982_v46  ;;  %vm2998_vm4 = vcmp.eq.s32.totalorder %v2441_v5, %v2736_v30  ;;  %v3045_v60 = vsub.f32 %v1658_v41, %v1658_v41 }
  0x66   :  { %2065 = vmatprep.subr.msk.mxu0 %vm2751_vm9, %v2392_v15  ;;  %2051 = vmatprep.subr.msk.mxu1 %vm2476_vm5, %v2392_v15  ;;  %v1657_v58 = vsel %vm2998_vm4, 1.0, %v2393_v17  ;;  %v3053_v63 = vand.u32 4294901760, %v3009_v34 }
  0x67   :  { %2066 = vmatpush3.msk.msra.mxu0 %vm2751_vm9, %v2392_v15  ;;  %2052 = vmatpush3.msk.msra.mxu1 %vm2476_vm5, %v2392_v15  ;;  %vm3005_vm5 = vcmp.eq.s32.totalorder %v2444_v6, %v2736_v30  ;;  %v3020_v6 = vand.u32 4294901760, %v2978_v54  ;;  %v3069_v36 = vsub.f32 %v1657_v58, %v1657_v58 }
  0x68   :  { %2067 = vmatprep.subr.msk.mxu0 %vm2764_vm10, %v2392_v15  ;;  %2040 = vmatprep.mubr.f32.mxu0 %v2633_v28 }
  0x69   :  { %2053 = vmatprep.subr.msk.mxu1 %vm2484_vm6, %v2392_v15  ;;  %2068 = vmatpush3.msk.msra.mxu0 %vm2764_vm10, %v2392_v15  ;;  %v1017_v19 = vsub.f32 %v2978_v54, %v3020_v6 }
  0x6a   :  { %2041 = vmatmul.mubr.f32.gmra.mxu0 %v2635_v29  ;;  %2054 = vmatpush3.msk.msra.mxu1 %vm2484_vm6, %v2392_v15  ;;  %vm3041_vm6 = vcmp.eq.s32.totalorder %v2447_v7, %v2736_v30  ;;  %v1656_v7 = vsel %vm3005_vm5, 1.0, %v2393_v17 }
  0x6b   :  { %2069 = vmatprep.subr.msk.mxu0 %vm2787_vm11, %v2392_v15  ;;  %2055 = vmatprep.subr.msk.mxu1 %vm2499_vm7, %v2392_v15  ;;  %v1655_v46 = vsel %vm3041_vm6, 1.0, %v2393_v17 }
  0x6c   :  { %2070 = vmatpush3.msk.msra.mxu0 %vm2787_vm11, %v2392_v15  ;;  %2056 = vmatpush3.msk.msra.mxu1 %vm2499_vm7, %v2392_v15  ;;  %vm3057_vm7 = vcmp.eq.s32.totalorder %v2450_v8, %v2736_v30  ;;  %v3072_v8 = vsub.f32 %v839_v21, %v3022_v45  ;;  %v3111_v21 = vand.u32 4294901760, %v3069_v36  ;;  %v3114_v41 = vsub.f32 %v1655_v46, %v1655_v46 }
  0x6d   :  { %2071 = vmatprep.subr.msk.mxu0 %vm2804_vm12, %v2392_v15  ;;  %2057 = vmatprep.subr.msk.mxu1 %vm2512_vm8, %v2392_v15  ;;  %v1654_v4 = vsel %vm3057_vm7, 1.0, %v2393_v17 }
  0x6e   :  { %2072 = vmatpush3.msk.msra.mxu0 %vm2804_vm12, %v2392_v15  ;;  %2058 = vmatpush3.msk.msra.mxu1 %vm2512_vm8, %v2392_v15  ;;  %vm3081_vm8 = vcmp.eq.s32.totalorder %v2429_v1, %v2736_v30  ;;  %v3097_v1 = vsub.f32 %v1656_v7, %v1656_v7  ;;  %v1031_v30 = vsub.f32 %v3009_v34, %v3053_v63 }
  0x6f   :  { %2059 = vmatprep.mubr.f32.mxu1 %v2531_v33  ;;  %2073 = vmatprep.subr.msk.mxu0 %vm2814_vm13, %v2392_v15  ;;  %v989_v33 = vsub.f32 %v2873_v14, %v2924_v37  ;;  %v1045_v7 = vsub.f32 %v3069_v36, %v3111_v21 }
  0x70   :  { %2060 = vmatmul.mubr.f32.vlgmr.msra.gmra.mxu1 %v2565_v43  ;;  %2074 = vmatpush3.msk.msra.mxu0 %vm2814_vm13, %v2392_v15  ;;  %v996_v43 = vsub.f32 %v2883_v18, %v2935_v39  ;;  %v3129_v58 = vand.u32 4294901760, %v3097_v1 }
  0x71   :  { %2103 = vmatprep.subr.mxu1 %v969_v2  ;;  %2075 = vmatprep.subr.msk.mxu0 %vm2845_vm14, %v2392_v15  ;;  %v990_v5 = vand.u32 4294901760, %v989_v33  ;;  %v3095_v33 = vsub.f32 %v840_v44, %v3047_v62 }
  0x72   :  { %2104 = vmatpush3.msra.mxu1 %v969_v2  ;;  %2076 = vmatpush3.msk.msra.mxu0 %vm2845_vm14, %v2392_v15  ;;  %v997_v49 = vand.u32 4294901760, %v996_v43  ;;  %v1024_v2 = vsub.f32 %v2988_v55, %v3029_v51  ;;  %v1018_v43 = vand.u32 4294901760, %v1017_v19  ;;  %v3145_v19 = vand.u32 4294901760, %v3114_v41 }
  0x73   :  { %2105 = vmatprep.subr.mxu1 %v976_v48  ;;  %2062 = vmatprep.mubr.f32.mxu1 %v2633_v28  ;;  %v1003_v28 = vsub.f32 %v2926_v38, %v2976_v53 }
  0x74   :  { %2077 = vmatprep.subr.msk.mxu0 %vm2869_vm15, %v2392_v15  ;;  %2106 = vmatpush3.msra.mxu1 %v976_v48  ;;  %v3092_v48 = vand.u32 4294901760, %v3045_v60  ;;  %v1025_v44 = vand.u32 4294901760, %v1024_v2 }
  0x75   :  { %2063 = vmatmul.mubr.f32.gmra.mxu1 %v2635_v29  ;;  %2078 = vmatpush3.msk.msra.mxu0 %vm2869_vm15, %v2392_v15  ;;  %v1010_v29 = vsub.f32 %v2954_v47, %v2994_v56  ;;  %v1004_v20 = vand.u32 4294901760, %v1003_v28 }
  0x76   :  { %2107 = vmatprep.subr.mxu1 %v983_v22  ;;  %2079 = vmatprep.subr.msk.mxu0 %vm2896_vm0, %v2392_v15  ;;  %v1038_v28 = vsub.f32 %v3045_v60, %v3092_v48 }
  0x77   :  { %2108 = vmatpush3.msra.mxu1 %v983_v22  ;;  %2080 = vmatpush3.msk.msra.mxu0 %vm2896_vm0, %v2392_v15  ;;  %v1011_v3 = vand.u32 4294901760, %v1010_v29  ;;  %v3500_v22 = vand.u32 4294901760, %v3072_v8  ;;  %v3131_v29 = vsub.f32 %v1654_v4, %v1654_v4 }
  0x78   :  { %2109 = vmatprep.subr.mxu1 %v990_v5  ;;  %2081 = vmatprep.subr.msk.mxu0 %vm2910_vm1, %v2392_v15  ;;  %v1039_v46 = vand.u32 4294901760, %v1038_v28  ;;  %v1059_v28 = vsub.f32 %v3114_v41, %v3145_v19 }
  0x79   :  { %2110 = vmatpush3.msra.mxu1 %v990_v5  ;;  %2082 = vmatpush3.msk.msra.mxu0 %vm2910_vm1, %v2392_v15  ;;  %v1653_v5 = vsel %vm3081_vm8, 1.0, %v2393_v17  ;;  %v1032_v17 = vand.u32 4294901760, %v1031_v30  ;;  %v1052_v30 = vsub.f32 %v3097_v1, %v3129_v58  ;;  %v3161_v4 = vand.u32 4294901760, %v3131_v29 }
  0x7a   :  { %2111 = vmatprep.subr.mxu1 %v997_v49  ;;  %2083 = vmatprep.subr.msk.mxu0 %vm2939_vm2, %v2392_v15  ;;  %v3147_v2 = vsub.f32 %v1653_v5, %v1653_v5 }
  0x7b   :  { %2112 = vmatpush3.msra.mxu1 %v997_v49  ;;  %2084 = vmatpush3.msk.msra.mxu0 %vm2939_vm2, %v2392_v15  ;;  %v3499_v49 = vand.u32 4294901760, %v3095_v33 }
  0x7c   :  { %2113 = vmatprep.subr.mxu1 %v1004_v20  ;;  %2085 = vmatprep.subr.msk.mxu0 %vm2965_vm3, %v2392_v15 }
  0x7d   :  { %2114 = vmatpush3.msra.mxu1 %v1004_v20  ;;  %2086 = vmatpush3.msk.msra.mxu0 %vm2965_vm3, %v2392_v15  ;;  %v927_v20 = vsub.f32 %v3072_v8, %v3500_v22  ;;  %v1053_v22 = vand.u32 4294901760, %v1052_v30  ;;  %v841_v30 = vld [vmem:[#allocation7 + $0x10] sm:$0xff] }
  0x7e   :  { %2115 = vmatprep.subr.mxu1 %v1011_v3  ;;  %2087 = vmatprep.subr.msk.mxu0 %vm2998_vm4, %v2392_v15 }
  0x7f   :  { %2116 = vmatpush3.msra.mxu1 %v1011_v3  ;;  %2088 = vmatpush3.msk.msra.mxu0 %vm2998_vm4, %v2392_v15  ;;  %v937_v3 = vsub.f32 %v3095_v33, %v3499_v49  ;;  %v928_v5 = vand.u32 4294901760, %v927_v20  ;;  %v3172_v49 = vand.u32 4294901760, %v3147_v2 }
  0x80   :  { %2117 = vmatprep.subr.mxu1 %v1018_v43  ;;  %2089 = vmatprep.subr.msk.mxu0 %vm3005_vm5, %v2392_v15 }
  0x81   :  { %2118 = vmatpush3.msra.mxu1 %v1018_v43  ;;  %2090 = vmatpush3.msk.msra.mxu0 %vm3005_vm5, %v2392_v15  ;;  %v1046_v43 = vand.u32 4294901760, %v1045_v7  ;;  %v1066_v7 = vsub.f32 %v3131_v29, %v3161_v4  ;;  %v1073_v20 = vsub.f32 %v3147_v2, %v3172_v49 }
  0x82   :  { %2119 = vmatprep.subr.mxu1 %v1025_v44  ;;  %2091 = vmatprep.subr.msk.mxu0 %vm3041_vm6, %v2392_v15 }
  0x83   :  { %2120 = vmatpush3.msra.mxu1 %v1025_v44  ;;  %2092 = vmatpush3.msk.msra.mxu0 %vm3041_vm6, %v2392_v15  ;;  %v938_v44 = vand.u32 4294901760, %v937_v3  ;;  %v1067_v3 = vand.u32 4294901760, %v1066_v7 }
  0x84   :  { %2121 = vmatprep.subr.mxu1 %v1032_v17  ;;  %2093 = vmatprep.subr.msk.mxu0 %vm3057_vm7, %v2392_v15 }
  0x85   :  { %2122 = vmatpush3.msra.mxu1 %v1032_v17  ;;  %2094 = vmatpush3.msk.msra.mxu0 %vm3057_vm7, %v2392_v15  ;;  %v1060_v17 = vand.u32 4294901760, %v1059_v28 }
  0x86   :  { %2123 = vmatprep.subr.mxu1 %v1039_v46  ;;  %2095 = vmatprep.subr.msk.mxu0 %vm3081_vm8, %v2392_v15 }
  0x87   :  { %2124 = vmatpush3.msra.mxu1 %v1039_v46  ;;  %2096 = vmatpush3.msk.msra.mxu0 %vm3081_vm8, %v2392_v15  ;;  %v1074_v46 = vand.u32 4294901760, %v1073_v20 }
  0x88   :  { %2125 = vmatprep.subr.mxu1 %v1046_v43  ;;  %2097 = vmatprep.mubr.f32.mxu0 %v928_v5 }
  0x89   :  { %2126 = vmatpush3.msra.mxu1 %v1046_v43  ;;  %2141 = vmatprep.subr.mxu0 %v2797_v50  ;;  %v842_v43 = vld [vmem:[#allocation7 + $0x18] sm:$0xff] }
  0x8a   :  { %2098 = vmatmul.mubr.f32.vlgmr.msra.gmra.mxu0 %v938_v44  ;;  %2127 = vmatprep.subr.mxu1 %v1053_v22 }
  0x8b   :  { %2142 = vmatpush3.msra.mxu0 %v2797_v50  ;;  %2128 = vmatpush3.msra.mxu1 %v1053_v22  ;;  %v3195_v50 = vand.u32 4294901760, %v841_v30 }
  0x8c   :  { %2143 = vmatprep.subr.mxu0 %v2818_v57  ;;  %2129 = vmatprep.subr.mxu1 %v1060_v17 }
  0x8d   :  { %2144 = vmatpush3.msra.mxu0 %v2818_v57  ;;  %2130 = vmatpush3.msra.mxu1 %v1060_v17  ;;  %v3201_v57 = vand.u32 4294901760, %v842_v43 }
  0x8e   :  { %2145 = vmatprep.subr.mxu0 %v2849_v13  ;;  %2131 = vmatprep.subr.mxu1 %v1067_v3 }
  0x8f   :  { %2146 = vmatpush3.msra.mxu0 %v2849_v13  ;;  %2132 = vmatpush3.msra.mxu1 %v1067_v3  ;;  %v3212_v13 = vsub.f32 %v841_v30, %v3195_v50 }
  0x90   :  { %2147 = vmatprep.subr.mxu0 %v2873_v14  ;;  %2133 = vmatprep.subr.mxu1 %v1074_v46 }
  0x91   :  { %2148 = vmatpush3.msra.mxu0 %v2873_v14  ;;  %2134 = vmatpush3.msra.mxu1 %v1074_v46  ;;  %v3223_v14 = vsub.f32 %v842_v43, %v3201_v57 }
  0x92   :  { %2135 = vmatprep.mubr.f32.mxu1 %v3022_v45  ;;  %2149 = vmatprep.subr.mxu0 %v2883_v18 }
  0x93   :  { %2136 = vmatmul.mubr.f32.vlgmr.msra.gmra.mxu1 %v3047_v62  ;;  %2150 = vmatpush3.msra.mxu0 %v2883_v18  ;;  %v946_v18 = vand.u32 4294901760, %v3212_v13 }
  0x94   :  { %2179 = vmatprep.subr.msk.mxu1 %vm2751_vm9, %v2392_v15  ;;  %2151 = vmatprep.subr.mxu0 %v2926_v38 }
  0x95   :  { %2180 = vmatpush3.msk.msra.mxu1 %vm2751_vm9, %v2392_v15  ;;  %2152 = vmatpush3.msra.mxu0 %v2926_v38  ;;  %v956_v38 = vand.u32 4294901760, %v3223_v14 }
  0x96   :  { %2181 = vmatprep.subr.msk.mxu1 %vm2764_vm10, %v2392_v15  ;;  %2153 = vmatprep.subr.mxu0 %v2954_v47 }
  0x97   :  { %2182 = vmatpush3.msk.msra.mxu1 %vm2764_vm10, %v2392_v15  ;;  %2154 = vmatpush3.msra.mxu0 %v2954_v47  ;;  %v947_v47 = vsub.f32 %v3212_v13, %v946_v18 }
  0x98   :  { %2183 = vmatprep.subr.msk.mxu1 %vm2787_vm11, %v2392_v15  ;;  %2155 = vmatprep.subr.mxu0 %v2978_v54 }
  0x99   :  { %2184 = vmatpush3.msk.msra.mxu1 %vm2787_vm11, %v2392_v15  ;;  %2156 = vmatpush3.msra.mxu0 %v2978_v54  ;;  %v957_v54 = vsub.f32 %v3223_v14, %v956_v38 }
  0x9a   :  { %2185 = vmatprep.subr.msk.mxu1 %vm2804_vm12, %v2392_v15  ;;  %2157 = vmatprep.subr.mxu0 %v2988_v55 }
  0x9b   :  { %2186 = vmatpush3.msk.msra.mxu1 %vm2804_vm12, %v2392_v15  ;;  %2158 = vmatpush3.msra.mxu0 %v2988_v55  ;;  %v948_v55 = vand.u32 4294901760, %v947_v47 }
  0x9c   :  { %2187 = vmatprep.subr.msk.mxu1 %vm2814_vm13, %v2392_v15  ;;  %2159 = vmatprep.subr.mxu0 %v3009_v34 }
  0x9d   :  { %2188 = vmatpush3.msk.msra.mxu1 %vm2814_vm13, %v2392_v15  ;;  %2160 = vmatpush3.msra.mxu0 %v3009_v34  ;;  %v958_v34 = vand.u32 4294901760, %v957_v54 }
  0x9e   :  { %2189 = vmatprep.subr.msk.mxu1 %vm2845_vm14, %v2392_v15  ;;  %2161 = vmatprep.subr.mxu0 %v3045_v60 }
  0x9f   :  { %2190 = vmatpush3.msk.msra.mxu1 %vm2845_vm14, %v2392_v15  ;;  %2162 = vmatpush3.msra.mxu0 %v3045_v60 }
  0xa0   :  { %2191 = vmatprep.subr.msk.mxu1 %vm2869_vm15, %v2392_v15  ;;  %2163 = vmatprep.subr.mxu0 %v3069_v36 }
  0xa1   :  { %2192 = vmatpush3.msk.msra.mxu1 %vm2869_vm15, %v2392_v15  ;;  %2164 = vmatpush3.msra.mxu0 %v3069_v36 }
  0xa2   :  { %2193 = vmatprep.subr.msk.mxu1 %vm2896_vm0, %v2392_v15  ;;  %2165 = vmatprep.subr.mxu0 %v3097_v1 }
  0xa3   :  { %2194 = vmatpush3.msk.msra.mxu1 %vm2896_vm0, %v2392_v15  ;;  %2166 = vmatpush3.msra.mxu0 %v3097_v1 }
  0xa4   :  { %2195 = vmatprep.subr.msk.mxu1 %vm2910_vm1, %v2392_v15  ;;  %2167 = vmatprep.subr.mxu0 %v3114_v41 }
  0xa5   :  { %2196 = vmatpush3.msk.msra.mxu1 %vm2910_vm1, %v2392_v15  ;;  %2100 = vmatprep.mubr.f32.mxu0 %v948_v55 }
  0xa6   :  { %2168 = vmatpush3.msra.mxu0 %v3114_v41  ;;  %2197 = vmatprep.subr.msk.mxu1 %vm2939_vm2, %v2392_v15 }
  0xa7   :  { %2101 = vmatmul.mubr.f32.gmra.mxu0 %v958_v34  ;;  %2169 = vmatprep.subr.mxu0 %v3131_v29 }
  0xa8   :  { %2198 = vmatpush3.msk.msra.mxu1 %vm2939_vm2, %v2392_v15  ;;  %2170 = vmatpush3.msra.mxu0 %v3131_v29 }
  0xa9   :  { %2199 = vmatprep.subr.msk.mxu1 %vm2965_vm3, %v2392_v15  ;;  %2171 = vmatprep.subr.mxu0 %v3147_v2 }
  0xaa   :  { %2200 = vmatpush3.msk.msra.mxu1 %vm2965_vm3, %v2392_v15  ;;  %2172 = vmatpush3.msra.mxu0 %v3147_v2 }
  0xab   :  { %2173 = vmatprep.mubr.f32.mxu0 %v3072_v8  ;;  %2201 = vmatprep.subr.msk.mxu1 %vm2998_vm4, %v2392_v15 }
  0xac   :  { %2174 = vmatmul.mubr.f32.vlgmr.msra.gmra.mxu0 %v3095_v33  ;;  %2202 = vmatpush3.msk.msra.mxu1 %vm2998_vm4, %v2392_v15 }
  0xad   :  { %2217 = vmatprep.subr.mxu0 %v2833_v59  ;;  %2138 = vmatprep.mubr.f32.mxu1 %v3195_v50 }
  0xae   :  { %2203 = vmatprep.subr.msk.mxu1 %vm3005_vm5, %v2392_v15  ;;  %2218 = vmatpush3.msra.mxu0 %v2833_v59  ;;  %v3549_v59 = vand.u32 4294901760, %v3072_v8 }
  0xaf   :  { %2139 = vmatmul.mubr.f32.gmra.mxu1 %v3201_v57  ;;  %2219 = vmatprep.subr.mxu0 %v2862_v0 }
  0xb0   :  { %2204 = vmatpush3.msk.msra.mxu1 %vm3005_vm5, %v2392_v15  ;;  %2176 = vmatprep.mubr.f32.mxu0 %v3212_v13 }
  0xb1   :  { %2205 = vmatprep.subr.msk.mxu1 %vm3041_vm6, %v2392_v15  ;;  %2220 = vmatpush3.msra.mxu0 %v2862_v0  ;;  %v3550_v0 = vand.u32 4294901760, %v3095_v33 }
  0xb2   :  { %2177 = vmatmul.mubr.f32.gmra.mxu0 %v3223_v14  ;;  %2206 = vmatpush3.msk.msra.mxu1 %vm3041_vm6, %v2392_v15 }
  0xb3   :  { %2221 = vmatprep.subr.mxu0 %v2893_v24  ;;  %2207 = vmatprep.subr.msk.mxu1 %vm3057_vm7, %v2392_v15 }
  0xb4   :  { %2222 = vmatpush3.msra.mxu0 %v2893_v24  ;;  %2208 = vmatpush3.msk.msra.mxu1 %vm3057_vm7, %v2392_v15 }
  0xb5   :  { %2223 = vmatprep.subr.mxu0 %v2924_v37  ;;  %2209 = vmatprep.subr.msk.mxu1 %vm3081_vm8, %v2392_v15 }
  0xb6   :  { %2224 = vmatpush3.msra.mxu0 %v2924_v37  ;;  %2210 = vmatpush3.msk.msra.mxu1 %vm3081_vm8, %v2392_v15 }
  0xb7   :  { %2211 = vmatprep.mubr.f32.mxu1 %v3549_v59  ;;  %2225 = vmatprep.subr.mxu0 %v2935_v39 }
  0xb8   :  { %2212 = vmatmul.mubr.f32.vlgmr.msra.gmra.mxu1 %v3550_v0  ;;  %2226 = vmatpush3.msra.mxu0 %v2935_v39 }
  0xb9   :  { %2255 = vmatprep.subr.msk.mxu1 %vm2751_vm9, %v2392_v15  ;;  %2227 = vmatprep.subr.mxu0 %v2976_v53 }
  0xba   :  { %2256 = vmatpush3.msk.msra.mxu1 %vm2751_vm9, %v2392_v15  ;;  %2228 = vmatpush3.msra.mxu0 %v2976_v53 }
  0xbb   :  { %2257 = vmatprep.subr.msk.mxu1 %vm2764_vm10, %v2392_v15  ;;  %2214 = vmatprep.mubr.f32.mxu1 %v946_v18 }
  0xbc   :  { %2229 = vmatprep.subr.mxu0 %v2994_v56  ;;  %2258 = vmatpush3.msk.msra.mxu1 %vm2764_vm10, %v2392_v15 }
  0xbd   :  { %2215 = vmatmul.mubr.f32.gmra.mxu1 %v956_v38  ;;  %2230 = vmatpush3.msra.mxu0 %v2994_v56 }
  0xbe   :  { %2259 = vmatprep.subr.msk.mxu1 %vm2787_vm11, %v2392_v15  ;;  %2231 = vmatprep.subr.mxu0 %v3020_v6 }
  0xbf   :  { %2260 = vmatpush3.msk.msra.mxu1 %vm2787_vm11, %v2392_v15  ;;  %2232 = vmatpush3.msra.mxu0 %v3020_v6 }
  0xc0   :  { %2261 = vmatprep.subr.msk.mxu1 %vm2804_vm12, %v2392_v15  ;;  %2233 = vmatprep.subr.mxu0 %v3029_v51 }
  0xc1   :  { %2262 = vmatpush3.msk.msra.mxu1 %vm2804_vm12, %v2392_v15  ;;  %2234 = vmatpush3.msra.mxu0 %v3029_v51 }
  0xc2   :  { %2263 = vmatprep.subr.msk.mxu1 %vm2814_vm13, %v2392_v15  ;;  %2235 = vmatprep.subr.mxu0 %v3053_v63 }
  0xc3   :  { %2264 = vmatpush3.msk.msra.mxu1 %vm2814_vm13, %v2392_v15  ;;  %2236 = vmatpush3.msra.mxu0 %v3053_v63 }
  0xc4   :  { %2265 = vmatprep.subr.msk.mxu1 %vm2845_vm14, %v2392_v15  ;;  %2237 = vmatprep.subr.mxu0 %v3092_v48 }
  0xc5   :  { %2266 = vmatpush3.msk.msra.mxu1 %vm2845_vm14, %v2392_v15  ;;  %2238 = vmatpush3.msra.mxu0 %v3092_v48 }
  0xc6   :  { %2267 = vmatprep.subr.msk.mxu1 %vm2869_vm15, %v2392_v15  ;;  %2239 = vmatprep.subr.mxu0 %v3111_v21 }
  0xc7   :  { %2268 = vmatpush3.msk.msra.mxu1 %vm2869_vm15, %v2392_v15  ;;  %2240 = vmatpush3.msra.mxu0 %v3111_v21 }
  0xc8   :  { %2269 = vmatprep.subr.msk.mxu1 %vm2896_vm0, %v2392_v15  ;;  %2241 = vmatprep.subr.mxu0 %v3129_v58 }
  0xc9   :  { %2270 = vmatpush3.msk.msra.mxu1 %vm2896_vm0, %v2392_v15  ;;  %2242 = vmatpush3.msra.mxu0 %v3129_v58 }
  0xca   :  { %2271 = vmatprep.subr.msk.mxu1 %vm2910_vm1, %v2392_v15  ;;  %2243 = vmatprep.subr.mxu0 %v3145_v19 }
  0xcb   :  { %2272 = vmatpush3.msk.msra.mxu1 %vm2910_vm1, %v2392_v15  ;;  %2244 = vmatpush3.msra.mxu0 %v3145_v19 }
  0xcc   :  { %2273 = vmatprep.subr.msk.mxu1 %vm2939_vm2, %v2392_v15  ;;  %2245 = vmatprep.subr.mxu0 %v3161_v4 }
  0xcd   :  { %2274 = vmatpush3.msk.msra.mxu1 %vm2939_vm2, %v2392_v15  ;;  %2246 = vmatpush3.msra.mxu0 %v3161_v4 }
  0xce   :  { %2275 = vmatprep.subr.msk.mxu1 %vm2965_vm3, %v2392_v15  ;;  %2247 = vmatprep.subr.mxu0 %v3172_v49 }
  0xcf   :  { %2276 = vmatpush3.msk.msra.mxu1 %vm2965_vm3, %v2392_v15  ;;  %2248 = vmatpush3.msra.mxu0 %v3172_v49 }
  0xd0   :  { %2249 = vmatprep.mubr.f32.mxu0 %v3022_v45  ;;  %2277 = vmatprep.subr.msk.mxu1 %vm2998_vm4, %v2392_v15 }
  0xd1   :  { %2250 = vmatmul.mubr.f32.vlgmr.msra.gmra.mxu0 %v3047_v62  ;;  %2278 = vmatpush3.msk.msra.mxu1 %vm2998_vm4, %v2392_v15 }
  0xd2   :  { %2279 = vmatprep.subr.msk.mxu1 %vm3005_vm5, %v2392_v15  ;;  %2252 = vmatprep.mubr.f32.mxu0 %v3195_v50 }
  0xd3   :  { %2280 = vmatpush3.msk.msra.mxu1 %vm3005_vm5, %v2392_v15  ;;  %2287 = vmatprep.mubr.f32.mxu1 %v3022_v45 }
  0xd4   :  { %2281 = vmatprep.subr.msk.mxu1 %vm3041_vm6, %v2392_v15 }
  0xd5   :  { %2253 = vmatmul.mubr.f32.gmra.mxu0 %v3201_v57  ;;  %2282 = vmatpush3.msk.msra.mxu1 %vm3041_vm6, %v2392_v15 }
  0xd6   :  { %2283 = vmatprep.subr.msk.mxu1 %vm3057_vm7, %v2392_v15 }
  0xd7   :  { %2284 = vmatpush3.msk.msra.mxu1 %vm3057_vm7, %v2392_v15 }
  0xd8   :  { %2285 = vmatprep.subr.msk.mxu1 %vm3081_vm8, %v2392_v15 }
  0xd9   :  { %2286 = vmatpush3.msk.msra.mxu1 %vm3081_vm8, %v2392_v15 }
  0xda   :  { %2288 = vmatmul.mubr.f32.vlgmr.msra.gmra.mxu1 %v3047_v62 }
  0xdb   :  { %2290 = vmatprep.mubr.f32.mxu1 %v3195_v50 }
  0xde   :  { %2291 = vmatmul.mubr.f32.gmra.mxu1 %v3201_v57 }
  0xfe   :  { %v1951_v32 = vpop.f32.mrf.mxu0 }
 0x100   :  { %v252_v40 = vpop.f32.mrf.mxu0 }
 0x107   :  { %v1973_v52 = vpop.f32.mrf.mxu1 }
 0x108   :  { %v400_v44 = vadd.f32 %v1973_v52, %v1951_v32 }
 0x109   :  { %v393_v9 = vpop.f32.mrf.mxu1 }
 0x10a   :  { %v394_v19 = vadd.f32 %v393_v9, %v252_v40 }
 0x10b   :  { %v1954_v10 = vpop.f32.mrf.mxu0 }
 0x10d   :  { %v272_v11 = vpop.f32.mrf.mxu0 }
 0x110   :  { %v1995_v61 = vpop.f32.mrf.mxu0 }
 0x111   :  { %v507_v43 = vadd.f32 %v1995_v61, %v400_v44 }
 0x112   :  { %v499_v24 = vpop.f32.mrf.mxu0 }
 0x113   :  { %v1976_v25 = vpop.f32.mrf.mxu1  ;;  %v500_v7 = vadd.f32 %v499_v24, %v394_v19 }
 0x114   :  { %v412_v50 = vadd.f32 %v1976_v25, %v1954_v10 }
 0x115   :  { %v405_v37 = vpop.f32.mrf.mxu1 }
 0x116   :  { %v1998_v35 = vpop.f32.mrf.mxu0  ;;  %v406_v17 = vadd.f32 %v405_v37, %v272_v11 }
 0x117   :  { %v521_v11 = vadd.f32 %v1998_v35, %v412_v50 }
 0x118   :  { %v513_v23 = vpop.f32.mrf.mxu0 }
 0x119   :  { %v514_v47 = vadd.f32 %v513_v23, %v406_v17 }
 0x11c   :  { %v2017_v39 = vpop.f32.mrf.mxu1 }
 0x11d   :  { %v610_v54 = vadd.f32 %v2017_v39, %v507_v43 }
 0x11e   :  { %v601_v27 = vpop.f32.mrf.mxu1 }
 0x11f   :  { %v602_v57 = vadd.f32 %v601_v27, %v500_v7 }
 0x121   :  { %v2020_v56 = vpop.f32.mrf.mxu1 }
 0x123   :  { %v617_v31 = vpop.f32.mrf.mxu1 }
 0x124   :  { %v618_v52 = vadd.f32 %v617_v31, %v514_v47 }
 0x125   :  { %v2039_v15 = vpop.f32.mrf.mxu0 }
 0x126   :  { %v727_v9 = vadd.f32 %v2039_v15, %v610_v54 }
 0x127   :  { %v720_v53 = vpop.f32.mrf.mxu0 }
 0x128   :  { %v721_v55 = vadd.f32 %v720_v53, %v602_v57 }
 0x12a   :  { %v3485_v26 = vpop.f32.mrf.mxu0 }
 0x12c   :  { %v732_v45 = vpop.f32.mrf.mxu0 }
 0x130   :  { %v2061_v6 = vpop.f32.mrf.mxu1 }
 0x131   :  { %v824_v39 = vadd.f32 %v2061_v6, %v727_v9 }
 0x132   :  { %v817_v12 = vpop.f32.mrf.mxu1 }
 0x133   :  { %v818_v24 = vadd.f32 %v817_v12, %v721_v55 }
 0x135   :  { %v3487_v62 = vpop.f32.mrf.mxu1 }
 0x137   :  { %v829_v16 = vpop.f32.mrf.mxu1 }
 0x14a   :  { %v2099_v51 = vpop.f32.mrf.mxu0 }
 0x14c   :  { %v930_v60 = vpop.f32.mrf.mxu0 }
 0x153   :  { %v2137_v8 = vpop.f32.mrf.mxu1 }
 0x154   :  { %v1118_v5 = vadd.f32 %v2137_v8, %v2099_v51 }
 0x155   :  { %v1111_v48 = vpop.f32.mrf.mxu1 }
 0x156   :  { %v1112_v28 = vadd.f32 %v1111_v48, %v930_v60  ;;  %v626_v60 = vadd.f32 %v2020_v56, %v521_v11 }
 0x167   :  { %v2102_v63 = vpop.f32.mrf.mxu0 }
 0x169   :  { %v950_v36 = vpop.f32.mrf.mxu0 }
 0x16c   :  { %v2175_v42 = vpop.f32.mrf.mxu0 }
 0x16d   :  { %v1241_v20 = vadd.f32 %v2175_v42, %v1118_v5  ;;  %v739_v42 = vadd.f32 %v3485_v26, %v626_v60 }
 0x16e   :  { %v1233_v1 = vpop.f32.mrf.mxu0 }
 0x16f   :  { %v2140_v33 = vpop.f32.mrf.mxu1  ;;  %v1234_v46 = vadd.f32 %v1233_v1, %v1112_v28 }
 0x170   :  { %v1130_v3 = vadd.f32 %v2140_v33, %v2102_v63  ;;  %v733_v63 = vadd.f32 %v732_v45, %v618_v52  ;;  %v836_v33 = vadd.f32 %v3487_v62, %v739_v42 }
 0x171   :  { %v1123_v21 = vpop.f32.mrf.mxu1 }
 0x172   :  { %v2178_v22 = vpop.f32.mrf.mxu0  ;;  %v1124_v30 = vadd.f32 %v1123_v21, %v950_v36  ;;  %v830_v35 = vadd.f32 %v829_v16, %v733_v63 }
 0x173   :  { %v1255_v59 = vadd.f32 %v2178_v22, %v1130_v3 }
 0x174   :  { %v1247_v49 = vpop.f32.mrf.mxu0 }
 0x175   :  { %v1248_v0 = vadd.f32 %v1247_v49, %v1124_v30 }
 0x178   :  { %v2213_v41 = vpop.f32.mrf.mxu1 }
 0x179   :  { %v1352_v18 = vadd.f32 %v2213_v41, %v1241_v20 }
 0x17a   :  { %v1343_v58 = vpop.f32.mrf.mxu1 }
 0x17b   :  { %v1344_v38 = vadd.f32 %v1343_v58, %v1234_v46 }
 0x17d   :  { %v2216_v2 = vpop.f32.mrf.mxu1 }
 0x17e   :  { %v1368_v10 = vadd.f32 %v2216_v2, %v1255_v59 }
 0x17f   :  { %v1359_v13 = vpop.f32.mrf.mxu1 }
 0x180   :  { %v1360_v25 = vadd.f32 %v1359_v13, %v1248_v0 }
 0x191   :  { %v2251_v29 = vpop.f32.mrf.mxu0 }
 0x192   :  { %v1493_v32 = vadd.f32 %v2251_v29, %v1352_v18 }
 0x193   :  { %v1486_v4 = vpop.f32.mrf.mxu0 }
 0x194   :  { %v1487_v40 = vadd.f32 %v1486_v4, %v1344_v38 }
 0x195   :  { %v2254_v14 = vpop.f32.mrf.mxu0 }
 0x196   :  { %v1505_v53 = vadd.f32 %v2254_v14, %v1368_v10 }
 0x197   :  { %v1498_v37 = vpop.f32.mrf.mxu0 }
 0x198   :  { %v1499_v36 = vadd.f32 %v1498_v37, %v1360_v25 }
 0x19a   :  { %v2289_v34 = vpop.f32.mrf.mxu1 }
 0x19b   :  { %v1598_v27 = vadd.f32 %v2289_v34, %v1493_v32 }
 0x19c   :  { %v1591_v61 = vpop.f32.mrf.mxu1 }
 0x19d   :  { %v1592_v51 = vadd.f32 %v1591_v61, %v1487_v40  ;;  %v1614_v31 = vmul.f32 %v1598_v27, %v824_v39 }
 0x19e   :  { %v2292_v23 = vpop.f32.mrf.mxu1 }
 0x19f   :  { %v1613_v8 = vmul.f32 %v1592_v51, %v818_v24  ;;  %v1610_v15 = vadd.f32 %v2292_v23, %v1505_v53 }
 0x1a0   :  { %v1603_v48 = vpop.f32.mrf.mxu1 }
 0x1a1   :  { %v1604_v12 = vadd.f32 %v1603_v48, %v1499_v36  ;;  %v1617_v1 = vadd.f32 %v1614_v31, %v1613_v8  ;;  %v1616_v22 = vmul.f32 %v1610_v15, %v836_v33 }
 0x1a3   :  { %v1615_v21 = vmul.f32 %v1604_v12, %v830_v35 }
 0x1a5   :  { %v1618_v41 = vadd.f32 %v1617_v1, %v1615_v21 }
 0x1a7   :  { %v1619_v56 = vadd.f32 %v1618_v41, %v1616_v22 }
 0x1a9   :  { %v1620_v45 = vrot.slane %v1619_v56, 4 }
 0x1ab   :  { %v1621_v49 = vadd.f32 %v1620_v45, %v1619_v56 }
 0x1ad   :  { %v1622_v6 = vrot.slane %v1621_v49, 2 }
 0x1af   :  { %v1623_v58 = vadd.f32 %v1622_v6, %v1621_v49 }
 0x1b1   :  { %v1624_v29 = vrot.slane %v1623_v58, 1 }
 0x1b3   :  { %v1625_v26 = vadd.f32 %v1624_v29, %v1623_v58 }
 0x1b5   :  { %1626 = vst [vmem:[#allocation8] sm:$0x1] %v1625_v26 }
 0x1b6   :  { %2372 = shalt.err (!%p2369_p5)
}
 0x1b7   :  { %1636 = dma.vmem_to_hbm [thread:$0]  %s1634_s6, 16, %s3498_s4, [#allocation4]  }
 0x1b8   :  { %2385 = dma.done.wait [#allocation4], 16  }
 0x1b9   :  { %2386 = vsyncadd [#allocation4], 4294967280 }
 0x1ba   :  { %1640 = vsyncpa [#allocation3], 1 }
 0x1bb   :  { %1641 = vsyncpa [#allocation6], 1 }
 0x1bc   :  { %1642 = vsyncpa [#allocation4], 1 }

</bundles_post_ra>
